<compile_context>
chip_gen: v7x
topology: tpu7x:2x2x1
jax: 0.10.0
libtpu: 0.0.40
codegen_flags: <defaults>
</compile_context>

<pallas_src>
import functools
import math

import jax
import jax.numpy as jnp
from jax.experimental import pallas as pl
from jax.experimental.pallas import tpu as pltpu


# ---------------------------------------------------------------------------
# Kernel 1: projection z = feature @ W^T, tiled over node rows so DMA overlaps
# the (tiny) MXU work.  bf16 operands, f32 accumulation, bf16 lane-dense out.
# ---------------------------------------------------------------------------
def gat_proj_kernel(feat_ref, wT_ref, z_ref):
    z_ref[...] = jnp.dot(feat_ref[...], wT_ref[...],
                         preferred_element_type=jnp.float32).astype(z_ref.dtype)


# ---------------------------------------------------------------------------
# Kernel 2: tiled masked edge-softmax + aggregation (flash-style online
# softmax).  grid = (dst tiles, src tiles); src is the reduction axis.
# cnt_ref is a scalar-prefetched SMEM table of per-tile edge counts.
# ---------------------------------------------------------------------------
def gat_attn_kernel(cnt_ref, s_dst_ref, s_src_ref, adj_ref, z_ref, h_ref,
                    m_sc, l_sc, acc_sc, *, tile_k, z_resident):
    i = pl.program_id(0)
    k = pl.program_id(1)

    @pl.when(k == 0)
    def _init():
        m_sc[...] = jnp.full_like(m_sc, -1e30)
        l_sc[...] = jnp.zeros_like(l_sc)
        acc_sc[...] = jnp.zeros_like(acc_sc)

    # Skip tiles with no edges entirely (all-masked tiles are a mathematical
    # no-op on m/l/acc, so gating the whole body is exact).
    @pl.when(cnt_ref[i, k] > 0)
    def _compute():
        # e[i, j] = leaky_relu(a_dst . z_i + a_src . z_j) for this tile.
        e = s_dst_ref[...] + s_src_ref[...]              # [TM,1]+[1,TK] -> [TM,TK]
        e = jnp.where(e >= 0, e, 0.01 * e)               # LeakyReLU, slope 0.01
        e = jnp.where(adj_ref[...] > 0, e, -jnp.inf)     # mask non-edges (int8 mask)

        m_prev = m_sc[...]
        m_new = jnp.maximum(m_prev, jnp.max(e, axis=-1, keepdims=True))
        corr = jnp.exp(m_prev - m_new)
        # TODO(synk): on v6e/v7x the exp could run in bf16 on the EUP; kept f32
        # so the same kernel stays accurate on v5e (no bf16 EUP).
        p = jnp.exp(e - m_new)                           # masked -> exp(-inf) = 0
        l_sc[...] = corr * l_sc[...] + jnp.sum(p, axis=-1, keepdims=True)

        if z_resident:
            # z is VMEM-resident: slice the src tile out of the full block.
            start = pl.multiple_of(k * tile_k, tile_k)
            z_tile = z_ref[pl.ds(start, tile_k), :]
        else:
            z_tile = z_ref[...]
        acc_sc[...] = corr * acc_sc[...] + jnp.dot(
            p.astype(z_tile.dtype), z_tile, preferred_element_type=jnp.float32)
        m_sc[...] = m_new

    @pl.when(k == pl.num_programs(1) - 1)
    def _finalize():
        l = l_sc[...]
        h = acc_sc[...] * pl.reciprocal(jnp.maximum(l, 1e-30), approx=True)
        # Zero-in-degree / padded dst rows -> 0 instead of Inf/NaN.
        h_ref[...] = jnp.where(l > 0, h, 0.0).astype(h_ref.dtype)


def gat_forward(feature, w_fc, w_attn, adj, *, tile_m=256, tile_k=512):
    """feature: [N, in_dim], w_fc: [out_dim, in_dim], w_attn: [1, 2*out_dim],
    adj: [N, N] mask (adj[dst, src] != 0 iff edge src -> dst).
    Returns [N, out_dim] float32.

    Default tiles (256 x 512) target v6e/v7x; on v5e prefer tile_m=128,
    tile_k=512 (one vector-store slot -> keep the acc rescale working set small).
    """
    N, in_dim = feature.shape
    out_dim = w_fc.shape[0]
    assert tile_m % 128 == 0 and tile_k % 128 == 0
    f32 = jnp.float32

    # Lane-dense padded feature dim; tile-aligned node count.  Tiles are
    # clamped for small graphs so we never blow up padding on tiny demos.
    d_pad = pl.cdiv(out_dim, 128) * 128
    n128 = pl.cdiv(N, 128) * 128
    tile_m = min(tile_m, n128)
    tile_k = min(tile_k, n128)
    step = math.lcm(tile_m, tile_k)
    n_pad = pl.cdiv(N, step) * step

    # ---- host-side O(N)/O(param) prep ---------------------------------------
    wT = jnp.zeros((in_dim, d_pad), f32).at[:, :out_dim].set(w_fc.astype(f32).T)
    feat_p = jnp.zeros((n_pad, in_dim), jnp.bfloat16).at[:N].set(
        feature.astype(jnp.bfloat16))
    adj_p = jnp.zeros((n_pad, n_pad), jnp.int8).at[:N, :N].set(
        (adj > 0).astype(jnp.int8))

    # Per-node attention score halves, in f32 straight from the un-rounded
    # features: s = feat @ (W^T a).  Replaces the old lane-width-2 kernel
    # output (masked vst.msk stores) and the [N,Dp]@[Dp,2] skinny matmul.
    a_both = jnp.stack([w_attn[0, :out_dim].astype(f32),       # a_src
                        w_attn[0, out_dim:].astype(f32)], 1)   # a_dst
    s = feature.astype(f32) @ (w_fc.astype(f32).T @ a_both)    # [N, 2]
    s_src_row = jnp.zeros((1, n_pad), f32).at[0, :N].set(s[:, 0])
    s_dst_col = jnp.zeros((n_pad, 1), f32).at[:N, 0].set(s[:, 1])

    # Per-(dst-tile, src-tile) edge counts -> SMEM via scalar prefetch.
    n_m, n_k = n_pad // tile_m, n_pad // tile_k
    tile_counts = adj_p.astype(jnp.int32).reshape(
        n_m, tile_m, n_k, tile_k).sum(axis=(1, 3))

    # ---- Kernel 1: projection (row-tiled, pipelined) --------------------------
    row_tile = math.gcd(n_pad, 512)
    z_bf16 = pl.pallas_call(
        gat_proj_kernel,
        out_shape=jax.ShapeDtypeStruct((n_pad, d_pad), jnp.bfloat16),
        grid_spec=pltpu.PrefetchScalarGridSpec(
            num_scalar_prefetch=0,
            grid=(n_pad // row_tile,),
            in_specs=[pl.BlockSpec((row_tile, in_dim), lambda r: (r, 0)),
                      pl.BlockSpec((in_dim, d_pad), lambda r: (0, 0))],
            out_specs=pl.BlockSpec((row_tile, d_pad), lambda r: (r, 0))),
        compiler_params=pltpu.CompilerParams(
            dimension_semantics=("parallel",)),
    )(feat_p, wT.astype(jnp.bfloat16))

    # ---- Kernel 2: VMEM budget & z residency decision -------------------------
    def attn_vmem_bytes(resident):
        dbl = 2  # double-buffered BlockSpec operands
        adj_b = tile_m * tile_k * 1 * dbl                      # int8 adj tiles
        sd_b = tile_m * 128 * 4 * dbl                          # (TM,1) f32, lane-padded
        ss_b = 8 * tile_k * 4 * dbl                            # (1,TK) f32, sublane-padded
        z_b = (n_pad if resident else tile_k) * d_pad * 2 * dbl
        out_b = tile_m * d_pad * 2 * dbl                       # bf16 h tiles
        scr_b = 2 * tile_m * 128 * 4 + tile_m * d_pad * 4      # m, l, acc scratch
        return adj_b + sd_b + ss_b + z_b + out_b + scr_b

    # Budget sized for v7x (64 MiB per TensorCore, 2 TCs); v5e/v6e have 128 MiB.
    vmem_budget = 40 * 1024 * 1024
    z_resident = attn_vmem_bytes(True) <= vmem_budget
    vmem_limit = int(min(64 << 20,
                         max(attn_vmem_bytes(z_resident) + (8 << 20), 24 << 20)))

    z_spec = (pl.BlockSpec((n_pad, d_pad), lambda i, k, cnt: (0, 0))   # resident
              if z_resident else
              pl.BlockSpec((tile_k, d_pad), lambda i, k, cnt: (k, 0)))  # streamed

    kernel2 = functools.partial(gat_attn_kernel,
                                tile_k=tile_k, z_resident=z_resident)

    h_pad = pl.pallas_call(
        kernel2,
        out_shape=jax.ShapeDtypeStruct((n_pad, d_pad), jnp.bfloat16),
        grid_spec=pltpu.PrefetchScalarGridSpec(
            num_scalar_prefetch=1,
            grid=(n_m, n_k),
            in_specs=[
                pl.BlockSpec((tile_m, 1), lambda i, k, cnt: (i, 0)),        # s_dst
                pl.BlockSpec((1, tile_k), lambda i, k, cnt: (0, k)),        # s_src
                pl.BlockSpec((tile_m, tile_k), lambda i, k, cnt: (i, k)),   # adj
                z_spec,                                                     # z
            ],
            out_specs=pl.BlockSpec((tile_m, d_pad), lambda i, k, cnt: (i, 0)),
            scratch_shapes=[pltpu.VMEM((tile_m, 1), jnp.float32),   # running max
                            pltpu.VMEM((tile_m, 1), jnp.float32),   # running sum
                            pltpu.VMEM((tile_m, d_pad), jnp.float32)],  # accumulator
        ),
        compiler_params=pltpu.CompilerParams(
            dimension_semantics=("parallel", "arbitrary"),
            vmem_limit_bytes=vmem_limit),
    )(tile_counts, s_dst_col, s_src_row, adj_p, z_bf16)

    return h_pad[:N, :out_dim].astype(f32)


def gat_reference(feature, w_fc, w_attn, adj):
    """Pure-JAX f32 reference mirroring the PyTorch/DGL semantics."""
    out_dim = w_fc.shape[0]
    z = feature @ w_fc.T
    a_src = w_attn[0, :out_dim]
    a_dst = w_attn[0, out_dim:]
    e = (z @ a_dst)[:, None] + (z @ a_src)[None, :]        # [dst, src]
    e = jnp.where(e >= 0, e, 0.01 * e)
    e = jnp.where(adj > 0, e, -jnp.inf)
    alpha = jax.nn.softmax(e, axis=-1)
    return alpha @ z


if __name__ == "__main__":
    N, IN_DIM, OUT_DIM = 256, 8, 32

    key = jax.random.PRNGKey(0)
    k_feat, k_fc, k_attn, k_adj = jax.random.split(key, 4)

    feature = jax.random.normal(k_feat, (N, IN_DIM), dtype=jnp.float32)
    w_fc = jax.random.normal(k_fc, (OUT_DIM, IN_DIM), dtype=jnp.float32) * 0.1
    w_attn = jax.random.normal(k_attn, (1, 2 * OUT_DIM), dtype=jnp.float32) * 0.1

    # Random directed graph with self-loops (every node has >= 1 in-edge, as in
    # typical DGL usage where reduce_func needs a non-empty mailbox).
    adj = jax.random.bernoulli(k_adj, p=0.1, shape=(N, N)).astype(jnp.float32)
    adj = jnp.maximum(adj, jnp.eye(N, dtype=jnp.float32))

    h = jax.block_until_ready(gat_forward(feature, w_fc, w_attn, adj))
    h_ref = gat_reference(feature, w_fc, w_attn, adj)

    assert h.shape == h_ref.shape
    # bf16 MXU operands + bf16 output + approx reciprocal -> bf16-class tolerance.
    assert jnp.allclose(h, h_ref, atol=2e-2, rtol=2e-2), \
        f"mismatch vs reference, max abs err = {float(jnp.max(jnp.abs(h - h_ref)))}"

    print("KERNEL_OK")
</pallas_src>

<mosaic_0001>
module attributes {stable_mosaic.version = 11 : i64} {
  func.func @gat_proj_kernel(%arg0: i32, %arg1: memref<256x8xbf16, #tpu.memory_space<vmem>>, %arg2: memref<8x128xbf16, #tpu.memory_space<vmem>>, %arg3: memref<256x128xbf16, #tpu.memory_space<vmem>>) attributes {dimension_semantics = [#tpu.dimension_semantics<parallel>], iteration_bounds = array<i64: 1>, scalar_prefetch = 0 : i64, scratch_operands = 0 : i64, tpu.core_type = #tpu.core_type<tc>, window_params = [{transform_indices = @transform_0, window_bounds = array<i64: 256, 8>}, {pipeline_mode = #tpu.pipeline_mode<synchronous>, transform_indices = @transform_1, window_bounds = array<i64: 8, 128>}, {transform_indices = @transform_2, window_bounds = array<i64: 256, 128>}]} {
    %c0 = arith.constant 0 : index
    %c0_0 = arith.constant 0 : index
    %0 = vector.load %arg1[%c0, %c0_0] : memref<256x8xbf16, #tpu.memory_space<vmem>>, vector<256x8xbf16>
    %c0_1 = arith.constant 0 : index
    %c0_2 = arith.constant 0 : index
    %1 = vector.load %arg2[%c0_1, %c0_2] : memref<8x128xbf16, #tpu.memory_space<vmem>>, vector<8x128xbf16>
    %cst = arith.constant dense<0.000000e+00> : vector<256x128xf32>
    %2 = tpu.matmul %0, %1, %cst {dimension_numbers = #tpu.dot_dimension_numbers<[1], [0], [0], [1], [0, 0, 1, 1], [], []>} : vector<256x8xbf16>, vector<8x128xbf16>, vector<256x128xf32> -> vector<256x128xf32>
    %3 = arith.truncf %2 : vector<256x128xf32> to vector<256x128xbf16>
    %c0_3 = arith.constant 0 : index
    %c0_4 = arith.constant 0 : index
    %4 = vector.load %arg3[%c0_3, %c0_4] : memref<256x128xbf16, #tpu.memory_space<vmem>>, vector<256x128xbf16>
    tpu.vector_store %arg3[%c0_3, %c0_4], %3 {strides = array<i32>} : memref<256x128xbf16, #tpu.memory_space<vmem>>, vector<256x128xbf16>,
    return
  }
  func.func @transform_0(%arg0: i32) -> (i32, i32) {
    %c0_i32 = arith.constant 0 : i32
    %c0_i32_0 = arith.constant 0 : i32
    return %arg0, %c0_i32 : i32, i32
  }
  func.func @transform_1(%arg0: i32) -> (i32, i32) {
    %c0_i32 = arith.constant 0 : i32
    %c0_i32_0 = arith.constant 0 : i32
    %c0_i32_1 = arith.constant 0 : i32
    return %c0_i32, %c0_i32_0 : i32, i32
  }
  func.func @transform_2(%arg0: i32) -> (i32, i32) {
    %c0_i32 = arith.constant 0 : i32
    %c0_i32_0 = arith.constant 0 : i32
    return %arg0, %c0_i32 : i32, i32
  }
}

</mosaic_0001>

<bundles_post_ra>
// kernel: tpu_custom_call.1
= control target key start
LH: loop header
LB: loop body
LE: loop exit
PB: predicated region body
PF: predicated region fallthrough
CT: control target
= control target key end

     0   :  { %vm175_vm0 = vcmask 1043456   ;;  %vm126_vm1 = vcmask 64512   ;;  %s902_s0 = inlined_call_operand.vmem [shape: bf16[256,8], index: 0, kind: input, shape index: {}]   ;;  %s903_s1 = inlined_call_operand.vmem [shape: bf16[8,128], index: 1, kind: input, shape index: {}]   ;;  %s904_s2 = inlined_call_operand.hbm [shape: bf16[256,128], index: 2, kind: output, shape index: {}]  }
   0x1   :  { %v45_v0 = vld [vmem:[%s903_s1] sm:$0xf]  ;;  %v767_v4 = vld [vmem:[%s902_s0 + $0x8] sm:$0xff]   ;;  %v769_v6 = vld [vmem:[%s902_s0 + $0x10] sm:$0xff]  }
   0x2   :  { %v765_v1 = vld [vmem:[%s902_s0] sm:$0xff]   ;;  %760 = vmatprep.subr.msk.bf16.mxu0 %vm175_vm0, %v45_v0  ;;  %761 = vmatprep.subr.msk.bf16.mxu1 %vm175_vm0, %v45_v0  ;;  %v177_v2 = vsel %vm175_vm0, %v45_v0, 0  ;;  %v768_v5 = vld [vmem:[%s902_s0 + $0x48] sm:$0xff]   ;;  %v770_v7 = vld [vmem:[%s902_s0 + $0x50] sm:$0xff]  }
   0x3   :  { %725 = vmatpush3.bf16.msra.mxu0 %v177_v2  ;;  %759 = vmatpush3.bf16.msra.mxu1 %v177_v2  ;;  %v766_v3 = vld [vmem:[%s902_s0 + $0x40] sm:$0xff]   ;;  %v771_v8 = vld [vmem:[%s902_s0 + $0x18] sm:$0xff]  }
   0x4   :  { %726 = vmatprep.mubr.msk.bf16.mxu0 %vm126_vm1, %v765_v1  ;;  %742 = vmatprep.mubr.msk.bf16.mxu1 %vm126_vm1, %v766_v3  ;;  %v772_v9 = vld [vmem:[%s902_s0 + $0x58] sm:$0xff]   ;;  %v773_v10 = vld [vmem:[%s902_s0 + $0x20] sm:$0xff]  }
   0x5   :  { %v774_v11 = vld [vmem:[%s902_s0 + $0x60] sm:$0xff]  }
   0x6   :  { %727 = vmatmul.mubr.msk.bf16.vlgmr.msra.gmra.mrb[0].mxu0 %vm126_vm1, %v767_v4  ;;  %743 = vmatmul.mubr.msk.bf16.vlgmr.msra.gmra.mrb[0].mxu1 %vm126_vm1, %v768_v5 }
   0x7   :  { %730 = vmatprep.mubr.msk.bf16.mxu0 %vm126_vm1, %v769_v6  ;;  %746 = vmatprep.mubr.msk.bf16.mxu1 %vm126_vm1, %v770_v7 }
   0xe   :  { %731 = vmatmul.mubr.msk.bf16.gmra.mrb[4].mxu0 %vm126_vm1, %v771_v8  ;;  %747 = vmatmul.mubr.msk.bf16.gmra.mrb[4].mxu1 %vm126_vm1, %v772_v9 }
   0xf   :  { %734 = vmatprep.mubr.msk.bf16.mxu0 %vm126_vm1, %v773_v10  ;;  %750 = vmatprep.mubr.msk.bf16.mxu1 %vm126_vm1, %v774_v11 }
  0x10   :  { %7 = vsyncpa [#allocation3], 0  ;;  %v775_v12 = vld [vmem:[%s902_s0 + $0x28] sm:$0xff]   ;;  %v777_v14 = vld [vmem:[%s902_s0 + $0x30] sm:$0xff]  }
  0x11   :  { %v776_v13 = vld [vmem:[%s902_s0 + $0x68] sm:$0xff]   ;;  %v778_v15 = vld [vmem:[%s902_s0 + $0x70] sm:$0xff]   ;;  %v779_v16 = vld [vmem:[%s902_s0 + $0x38] sm:$0xff]  }
  0x12   :  { %v780_v17 = vld [vmem:[%s902_s0 + $0x78] sm:$0xff]   ;;  %s805_s0 = smov [#allocation2]  }
  0x13   :  { %s505_s14 = sshll.u32 %s805_s0, 4  ;;  %s506_s14 = int_to_ptr.vmem [resolvable:$true] %s505_s14 }
  0x14   :  { %s781_s15 = scalar_lea.vmem %s506_s14, 2048  ;;  %p786_p1 = scmp.lt.s32.totalorder %s506_s14, %s506_s14 }
  0x15   :  { %p782_p0 = scmp.ne.s32.totalorder %s506_s14, %s781_s15  ;;  %p787_p2 = scmp.lt.s32.totalorder %s781_s15, %s781_s15 }
  0x16   :  { %735 = vmatmul.mubr.msk.bf16.gmra.mrb[8].mxu0 %vm126_vm1, %v775_v12  ;;  %751 = vmatmul.mubr.msk.bf16.gmra.mrb[8].mxu1 %vm126_vm1, %v776_v13 }
  0x17   :  { %738 = vmatprep.mubr.msk.bf16.mxu0 %vm126_vm1, %v777_v14  ;;  %754 = vmatprep.mubr.msk.bf16.mxu1 %vm126_vm1, %v778_v15  ;;  %p788_p3 = por %p787_p2, %p786_p1 }
  0x19   :  { %p789_p4 = pnand %p788_p3, %p782_p0 }
  0x1e   :  { %739 = vmatmul.mubr.msk.bf16.gmra.mrb[12].mxu0 %vm126_vm1, %v779_v16  ;;  %755 = vmatmul.mubr.msk.bf16.gmra.mrb[12].mxu1 %vm126_vm1, %v780_v17 }
  0xd9   :  { %v728_v18 = vpop.f32.mrb[0].mxu0  ;;  %v744_v19 = vpop.f32.mrb[0].mxu1 }
  0xda   :  { %v213_v20 = vpop.f32.mrb[1].mxu0  ;;  %v277_v21 = vpop.f32.mrb[1].mxu1 }
  0xdb   :  { %v729_v22 = vpop.f32.mrb[2].mxu0  ;;  %v745_v24 = vpop.f32.mrb[2].mxu1 }
  0xdc   :  { %v620_v23 = vpack.c.bf16 %v729_v22, %v728_v18  ;;  %v216_v25 = vpop.f32.mrb[3].mxu0  ;;  %v660_v26 = vpack.c.bf16 %v745_v24, %v744_v19  ;;  %v280_v28 = vpop.f32.mrb[3].mxu1 }
  0xdd   :  { %v615_v27 = vpack.c.bf16 %v216_v25, %v213_v20  ;;  %v655_v29 = vpack.c.bf16 %v280_v28, %v277_v21 }
  0xde   :  { %692 = vst [vmem:[#allocation2 + $0x8] sm:$0xff] %v620_v23   ;;  %700 = vst [vmem:[#allocation2 + $0x48] sm:$0xff] %v660_v26  }
  0xdf   :  { %616 = vst [vmem:[#allocation2] sm:$0xff] %v615_v27   ;;  %699 = vst [vmem:[#allocation2 + $0x40] sm:$0xff] %v655_v29  }
  0xe1   :  { %v732_v30 = vpop.f32.mrb[4].mxu0  ;;  %v748_v31 = vpop.f32.mrb[4].mxu1 }
  0xe2   :  { %v229_v32 = vpop.f32.mrb[5].mxu0  ;;  %v293_v33 = vpop.f32.mrb[5].mxu1 }
  0xe3   :  { %v733_v34 = vpop.f32.mrb[6].mxu0  ;;  %v749_v36 = vpop.f32.mrb[6].mxu1 }
  0xe4   :  { %v630_v35 = vpack.c.bf16 %v733_v34, %v732_v30  ;;  %v232_v37 = vpop.f32.mrb[7].mxu0  ;;  %v670_v38 = vpack.c.bf16 %v749_v36, %v748_v31  ;;  %v296_v40 = vpop.f32.mrb[7].mxu1 }
  0xe5   :  { %v625_v39 = vpack.c.bf16 %v232_v37, %v229_v32  ;;  %v665_v41 = vpack.c.bf16 %v296_v40, %v293_v33 }
  0xe6   :  { %694 = vst [vmem:[#allocation2 + $0x18] sm:$0xff] %v630_v35   ;;  %702 = vst [vmem:[#allocation2 + $0x58] sm:$0xff] %v670_v38  }
  0xe7   :  { %693 = vst [vmem:[#allocation2 + $0x10] sm:$0xff] %v625_v39   ;;  %701 = vst [vmem:[#allocation2 + $0x50] sm:$0xff] %v665_v41  }
  0xe9   :  { %v736_v42 = vpop.f32.mrb[8].mxu0  ;;  %v752_v43 = vpop.f32.mrb[8].mxu1 }
  0xea   :  { %v245_v44 = vpop.f32.mrb[9].mxu0  ;;  %v309_v45 = vpop.f32.mrb[9].mxu1 }
  0xeb   :  { %v737_v46 = vpop.f32.mrb[10].mxu0  ;;  %v753_v48 = vpop.f32.mrb[10].mxu1 }
  0xec   :  { %v640_v47 = vpack.c.bf16 %v737_v46, %v736_v42  ;;  %v248_v49 = vpop.f32.mrb[11].mxu0  ;;  %v680_v50 = vpack.c.bf16 %v753_v48, %v752_v43  ;;  %v312_v52 = vpop.f32.mrb[11].mxu1 }
  0xed   :  { %v635_v51 = vpack.c.bf16 %v248_v49, %v245_v44  ;;  %v675_v53 = vpack.c.bf16 %v312_v52, %v309_v45 }
  0xee   :  { %696 = vst [vmem:[#allocation2 + $0x28] sm:$0xff] %v640_v47   ;;  %704 = vst [vmem:[#allocation2 + $0x68] sm:$0xff] %v680_v50  }
  0xef   :  { %695 = vst [vmem:[#allocation2 + $0x20] sm:$0xff] %v635_v51   ;;  %703 = vst [vmem:[#allocation2 + $0x60] sm:$0xff] %v675_v53  }
  0xf1   :  { %v740_v54 = vpop.f32.mrb[12].mxu0  ;;  %v756_v55 = vpop.f32.mrb[12].mxu1 }
  0xf2   :  { %v261_v56 = vpop.f32.mrb[13].mxu0  ;;  %v325_v57 = vpop.f32.mrb[13].mxu1 }
  0xf3   :  { %v741_v58 = vpop.f32.mrb[14].mxu0  ;;  %v757_v60 = vpop.f32.mrb[14].mxu1 }
  0xf4   :  { %v650_v59 = vpack.c.bf16 %v741_v58, %v740_v54  ;;  %v264_v61 = vpop.f32.mrb[15].mxu0  ;;  %v690_v62 = vpack.c.bf16 %v757_v60, %v756_v55  ;;  %v328_v0 = vpop.f32.mrb[15].mxu1 }
  0xf5   :  { %v645_v63 = vpack.c.bf16 %v264_v61, %v261_v56  ;;  %v685_v1 = vpack.c.bf16 %v328_v0, %v325_v57 }
  0xf6   :  { %698 = vst [vmem:[#allocation2 + $0x38] sm:$0xff] %v650_v59   ;;  %706 = vst [vmem:[#allocation2 + $0x78] sm:$0xff] %v690_v62  }
  0xf7   :  { %697 = vst [vmem:[#allocation2 + $0x30] sm:$0xff] %v645_v63   ;;  %705 = vst [vmem:[#allocation2 + $0x70] sm:$0xff] %v685_v1  }
  0xf8   :  { %792 = shalt.err (!%p789_p4)
}
  0xf9   :  { %s793_s17 = scalar_lea.hbm %s904_s2, 2048 }
  0xfa   :  { %p794_p5 = scmp.ne.s32.totalorder %s904_s2, %s793_s17  ;;  %p797_p6 = scmp.lt.u32.totalorder %s793_s17, %s904_s2 }
  0xfc   :  { %p799_p7 = pnand %p797_p6, %p794_p5 }
  0xfe   :  { %802 = shalt.err (!%p799_p7)
}
  0xff   :  { %s806_s22 = smov 64   ;;  %s807_s23 = smov 4  }
 0x100   :  { %511 = dma.vmem_to_hbm [thread:$0]  %s506_s14, 2048, %s904_s2, [#allocation3], %s806_s22, %s806_s22, %s807_s23  }
 0x101   :  { %803 = dma.done.wait [#allocation3], 2048  }
 0x102   :  { %804 = vsyncadd [#allocation3], 4294965248 }
 0x103   :  { %515 = vsyncpa [#allocation3], 1 }

</bundles_post_ra>
